<compile_context>
chip_gen: v6e
topology: v6e:2x2x1
jax: 0.10.0
libtpu: 0.0.40
codegen_flags: <defaults>
</compile_context>

<pallas_src>
import functools

import jax
import jax.numpy as jnp
from jax import lax
from jax.experimental import pallas as pl
from jax.experimental.pallas import tpu as pltpu

_LANES = 128
_SUBLANES = 8


def _round_up(x, m):
    return ((x + m - 1) // m) * m


def _pow_static(x, gamma):
    """x ** gamma with gamma known at trace time; avoid EUP pow for int gamma."""
    g = float(gamma)
    if g == int(g) and 0 <= int(g) <= 8:
        gi = int(g)
        if gi == 0:
            return jnp.ones_like(x)
        r = x
        for _ in range(gi - 1):
            r = r * x
        return r
    return x ** jnp.float32(g)


def _focal_loss_kernel(pred_ref, tgt_ref, out_ref, acc_ref, *,
                       alpha, gamma, n_valid, block_rows, steps, mask_tail):
    c = pl.program_id(0)   # core split (parallel)
    i = pl.program_id(1)   # row-block sweep (arbitrary / reduction)

    @pl.when(i == 0)
    def _():
        acc_ref[...] = jnp.zeros_like(acc_ref)

    p = pred_ref[...].astype(jnp.float32)
    # torch's target.long() truncates toward zero; astype(int32) matches.
    t_idx = tgt_ref[...].astype(jnp.int32)
    is_one = t_idx == 1

    probs = jnp.where(is_one, p, 1.0 - p)
    probs = jnp.clip(probs, 0.0001, 1.0)

    if mask_tail:
        # Mask tail / out-of-bounds lanes *before* log/pow: select probs=1 so the
        # masked contribution is exactly 0 and garbage data can't produce NaN/Inf.
        block_idx = c * steps + i
        row0 = block_idx * block_rows
        row_iota = lax.broadcasted_iota(jnp.int32, (block_rows, _LANES), 0)
        lane_iota = lax.broadcasted_iota(jnp.int32, (block_rows, _LANES), 1)
        elem = (row0 + row_iota) * _LANES + lane_iota
        probs = jnp.where(elem < n_valid, probs, 1.0)

    log_p = jnp.log(probs)
    pow_term = _pow_static(1.0 - probs, gamma)
    a = jnp.where(is_one, jnp.float32(alpha), jnp.float32(1.0 - alpha))
    loss = (-a) * pow_term * log_p

    # Vector accumulation: fold (block_rows,128) -> (8,128) with vreg-wise adds
    # (reduction axis is not a lane/sublane axis -> pure VPU, no XLU traffic).
    acc_ref[...] += loss.reshape(block_rows // _SUBLANES, _SUBLANES, _LANES).sum(axis=0)

    @pl.when(i == pl.num_programs(1) - 1)
    def _():
        out_ref[...] = acc_ref[...]


def focal_loss(pred, target, *, alpha=0.25, gamma=2.0, size_average=True,
               block_rows=2048):
    n = pred.size
    rows = pl.cdiv(n, _LANES)
    n_lane = rows * _LANES

    pred_flat = jnp.ravel(pred)
    tgt_flat = jnp.ravel(target)
    if n_lane != n:
        # Tiny tail pad (< 128 elements) just to make the array lane-reshapable;
        # padded elements are masked in-kernel anyway.
        pred_flat = jnp.pad(pred_flat, (0, n_lane - n))
        tgt_flat = jnp.pad(tgt_flat, (0, n_lane - n))
    pred2 = pred_flat.reshape(rows, _LANES)
    tgt2 = tgt_flat.reshape(rows, _LANES)

    # Block size: as many rows as useful, multiple of 8, capped by the input size.
    br = min(block_rows, _round_up(rows, _SUBLANES))
    br = max(_SUBLANES, _round_up(br, _SUBLANES))
    num_blocks = pl.cdiv(rows, br)

    # Split the row-block range across 2 TensorCores (helps v7x; serial elsewhere).
    n_split = 2 if num_blocks >= 2 else 1
    steps = pl.cdiv(num_blocks, n_split)

    # Masking is only needed when some lanes of some block fall outside the
    # valid element range.
    mask_tail = (n_split * steps * br * _LANES) != n

    kernel = functools.partial(
        _focal_loss_kernel, alpha=float(alpha), gamma=float(gamma),
        n_valid=int(n), block_rows=br, steps=steps, mask_tail=mask_tail)

    def in_map(c, i):
        # Clamp so a (masked) duplicate of the last block is fetched instead of
        # an out-of-range block when num_blocks is odd.
        return (jnp.minimum(c * steps + i, num_blocks - 1), 0)

    in_block = pl.BlockSpec((br, _LANES), in_map)

    partials = pl.pallas_call(
        kernel,
        out_shape=jax.ShapeDtypeStruct((n_split * _SUBLANES, _LANES), jnp.float32),
        grid_spec=pltpu.PrefetchScalarGridSpec(
            num_scalar_prefetch=0,
            grid=(n_split, steps),
            in_specs=[in_block, in_block],
            out_specs=pl.BlockSpec((_SUBLANES, _LANES), lambda c, i: (c, 0)),
            scratch_shapes=[pltpu.VMEM((_SUBLANES, _LANES), jnp.float32)],
        ),
        compiler_params=pltpu.CompilerParams(
            dimension_semantics=("parallel", "arbitrary")),
    )(pred2, tgt2)

    total = jnp.sum(partials)
    if size_average:
        return total / jnp.float32(n)
    return total


def _focal_loss_ref(pred, target, *, alpha=0.25, gamma=2.0, size_average=True):
    p = jnp.ravel(pred).astype(jnp.float32)
    t = jnp.ravel(target).astype(jnp.float32).astype(jnp.int32)
    is_one = (t == 1)
    probs = jnp.clip(jnp.where(is_one, p, 1.0 - p), 0.0001, 1.0)
    a = jnp.where(is_one, alpha, 1.0 - alpha)
    loss = -a * (1.0 - probs) ** gamma * jnp.log(probs)
    return jnp.mean(loss) if size_average else jnp.sum(loss)


if __name__ == "__main__":
    key = jax.random.PRNGKey(0)
    k_pred, k_tgt = jax.random.split(key)

    # pred: probabilities in (0, 1), target: binary mask, both NCHW-shaped.
    pred = jax.nn.sigmoid(jax.random.normal(k_pred, (2, 4, 16, 16), jnp.float32))
    target = (jax.random.uniform(k_tgt, (2, 4, 16, 16)) > 0.5).astype(jnp.float32)

    out = focal_loss(pred, target, alpha=0.25, gamma=2.0, size_average=True)
    out = jax.block_until_ready(out)

    ref = _focal_loss_ref(pred, target, alpha=0.25, gamma=2.0, size_average=True)
    assert jnp.allclose(out, ref, rtol=1e-5, atol=1e-6), (out, ref)

    # Also exercise a non-lane-aligned / multi-block path (tail masking, sum mode,
    # odd block count so the clamped-duplicate path is hit on core 1).
    pred_b = jax.nn.sigmoid(jax.random.normal(k_pred, (3, 5, 37, 41), jnp.float32))
    target_b = (jax.random.uniform(k_tgt, (3, 5, 37, 41)) > 0.5).astype(jnp.float32)
    out_b = jax.block_until_ready(
        focal_loss(pred_b, target_b, alpha=0.25, gamma=2.0, size_average=False,
                   block_rows=16))
    ref_b = _focal_loss_ref(pred_b, target_b, alpha=0.25, gamma=2.0,
                            size_average=False)
    assert jnp.allclose(out_b, ref_b, rtol=1e-5, atol=1e-4), (out_b, ref_b)

    print("KERNEL_OK")
</pallas_src>

<mosaic_0001>
module attributes {stable_mosaic.version = 11 : i64} {
  func.func @_focal_loss_kernel(%arg0: i32, %arg1: i32, %arg2: memref<16x128xf32, #tpu.memory_space<vmem>>, %arg3: memref<16x128xf32, #tpu.memory_space<vmem>>, %arg4: memref<8x128xf32, #tpu.memory_space<vmem>>, %arg5: memref<8x128xf32, #tpu.memory_space<vmem>>) attributes {dimension_semantics = [#tpu.dimension_semantics<parallel>, #tpu.dimension_semantics<arbitrary>], iteration_bounds = array<i64: 1, 1>, scalar_prefetch = 0 : i64, scratch_operands = 1 : i64, tpu.core_type = #tpu.core_type<tc>, window_params = [{transform_indices = @transform_0, window_bounds = array<i64: 16, 128>}, {transform_indices = @transform_1, window_bounds = array<i64: 16, 128>}, {transform_indices = @transform_2, window_bounds = array<i64: 8, 128>}]} {
    %c0_i32 = arith.constant 0 : i32
    %0 = arith.cmpi eq, %arg1, %c0_i32 : i32
    %1 = arith.extui %0 : i1 to i32
    %c0_i32_0 = arith.constant 0 : i32
    %2 = arith.cmpi ne, %1, %c0_i32_0 : i32
    scf.if %2 {
      %cst_17 = arith.constant 0.000000e+00 : f32
      %34 = vector.broadcast %cst_17 : f32 to vector<8x128xf32>
      %c0_18 = arith.constant 0 : index
      %c0_19 = arith.constant 0 : index
      %35 = vector.load %arg5[%c0_18, %c0_19] : memref<8x128xf32, #tpu.memory_space<vmem>>, vector<8x128xf32>
      tpu.vector_store %arg5[%c0_18, %c0_19], %34 {strides = array<i32>} : memref<8x128xf32, #tpu.memory_space<vmem>>, vector<8x128xf32>,
    } else {
    }
    %c0 = arith.constant 0 : index
    %c0_1 = arith.constant 0 : index
    %3 = vector.load %arg2[%c0, %c0_1] : memref<16x128xf32, #tpu.memory_space<vmem>>, vector<16x128xf32>
    %c0_2 = arith.constant 0 : index
    %c0_3 = arith.constant 0 : index
    %4 = vector.load %arg3[%c0_2, %c0_3] : memref<16x128xf32, #tpu.memory_space<vmem>>, vector<16x128xf32>
    %5 = arith.fptosi %4 : vector<16x128xf32> to vector<16x128xi32>
    %c1_i32 = arith.constant 1 : i32
    %6 = vector.broadcast %c1_i32 : i32 to vector<16x128xi32>
    %7 = arith.cmpi eq, %5, %6 : vector<16x128xi32>
    %cst = arith.constant 1.000000e+00 : f32
    %8 = vector.broadcast %cst : f32 to vector<16x128xf32>
    %9 = arith.subf %8, %3 : vector<16x128xf32>
    %10 = arith.select %7, %3, %9 : vector<16x128xi1>, vector<16x128xf32>
    %cst_4 = arith.constant 9.99999974E-5 : f32
    %cst_5 = arith.constant 1.000000e+00 : f32
    %11 = vector.broadcast %cst_4 : f32 to vector<16x128xf32>
    %12 = arith.maximumf %11, %10 : vector<16x128xf32>
    %13 = vector.broadcast %cst_5 : f32 to vector<16x128xf32>
    %14 = arith.minimumf %13, %12 : vector<16x128xf32>
    %15 = math.log %14 : vector<16x128xf32>
    %cst_6 = arith.constant 1.000000e+00 : f32
    %16 = vector.broadcast %cst_6 : f32 to vector<16x128xf32>
    %17 = arith.subf %16, %14 : vector<16x128xf32>
    %18 = arith.mulf %17, %17 : vector<16x128xf32>
    %cst_7 = arith.constant 2.500000e-01 : f32
    %cst_8 = arith.constant 7.500000e-01 : f32
    %19 = vector.broadcast %cst_7 : f32 to vector<16x128xf32>
    %20 = vector.broadcast %cst_8 : f32 to vector<16x128xf32>
    %21 = arith.select %7, %19, %20 : vector<16x128xi1>, vector<16x128xf32>
    %cst_9 = arith.constant 0.000000e+00 : f32
    %22 = vector.broadcast %cst_9 : f32 to vector<16x128xf32>
    %23 = arith.subf %22, %21 : vector<16x128xf32>
    %24 = arith.mulf %23, %18 : vector<16x128xf32>
    %25 = arith.mulf %24, %15 : vector<16x128xf32>
    %c0_10 = arith.constant 0 : index
    %c0_11 = arith.constant 0 : index
    %26 = vector.load %arg5[%c0_10, %c0_11] : memref<8x128xf32, #tpu.memory_space<vmem>>, vector<8x128xf32>
    %27 = vector.shape_cast %25 : vector<16x128xf32> to vector<2x8x128xf32>
    %cst_12 = arith.constant dense<0.000000e+00> : vector<8x128xf32>
    %28 = vector.multi_reduction <add>, %27, %cst_12 [0] : vector<2x8x128xf32> to vector<8x128xf32>
    %29 = arith.addf %26, %28 : vector<8x128xf32>
    %c0_13 = arith.constant 0 : index
    %c0_14 = arith.constant 0 : index
    %30 = vector.load %arg5[%c0_13, %c0_14] : memref<8x128xf32, #tpu.memory_space<vmem>>, vector<8x128xf32>
    tpu.vector_store %arg5[%c0_13, %c0_14], %29 {strides = array<i32>} : memref<8x128xf32, #tpu.memory_space<vmem>>, vector<8x128xf32>,
    %c0_i32_15 = arith.constant 0 : i32
    %31 = arith.cmpi eq, %arg1, %c0_i32_15 : i32
    %32 = arith.extui %31 : i1 to i32
    %c0_i32_16 = arith.constant 0 : i32
    %33 = arith.cmpi ne, %32, %c0_i32_16 : i32
    scf.if %33 {
      %c0_17 = arith.constant 0 : index
      %c0_18 = arith.constant 0 : index
      %34 = vector.load %arg5[%c0_17, %c0_18] : memref<8x128xf32, #tpu.memory_space<vmem>>, vector<8x128xf32>
      %c0_19 = arith.constant 0 : index
      %c0_20 = arith.constant 0 : index
      %35 = vector.load %arg4[%c0_19, %c0_20] : memref<8x128xf32, #tpu.memory_space<vmem>>, vector<8x128xf32>
      tpu.vector_store %arg4[%c0_19, %c0_20], %34 {strides = array<i32>} : memref<8x128xf32, #tpu.memory_space<vmem>>, vector<8x128xf32>,
    } else {
    }
    return
  }
  func.func @transform_0(%arg0: i32, %arg1: i32) -> (i32, i32) {
    %c1_i32 = arith.constant 1 : i32
    %0 = arith.muli %arg0, %c1_i32 : i32
    %1 = arith.addi %0, %arg1 : i32
    %c0_i32 = arith.constant 0 : i32
    %2 = arith.minsi %1, %c0_i32 : i32
    %c0_i32_0 = arith.constant 0 : i32
    %c0_i32_1 = arith.constant 0 : i32
    return %2, %c0_i32_0 : i32, i32
  }
  func.func @transform_1(%arg0: i32, %arg1: i32) -> (i32, i32) {
    %c1_i32 = arith.constant 1 : i32
    %0 = arith.muli %arg0, %c1_i32 : i32
    %1 = arith.addi %0, %arg1 : i32
    %c0_i32 = arith.constant 0 : i32
    %2 = arith.minsi %1, %c0_i32 : i32
    %c0_i32_0 = arith.constant 0 : i32
    %c0_i32_1 = arith.constant 0 : i32
    return %2, %c0_i32_0 : i32, i32
  }
  func.func @transform_2(%arg0: i32, %arg1: i32) -> (i32, i32) {
    %c0_i32 = arith.constant 0 : i32
    %c0_i32_0 = arith.constant 0 : i32
    return %arg0, %c0_i32 : i32, i32
  }
}

</mosaic_0001>

<bundles_post_ra>
// kernel: tpu_custom_call.1
= control target key start
LH: loop header
LB: loop body
LE: loop exit
PB: predicated region body
PF: predicated region fallthrough
CT: control target
= control target key end

     0   :  { %7 = vsyncpa [#allocation4], 0  ;;  %s236_s0 = inlined_call_operand.hbm [shape: f32[16,128], index: 0, kind: input, shape index: {}]   ;;  %s237_s1 = inlined_call_operand.hbm [shape: f32[16,128], index: 1, kind: input, shape index: {}]   ;;  %s238_s2 = inlined_call_operand.hbm [shape: f32[8,128], index: 2, kind: output, shape index: {}]  }
   0x1   :  { %8 = vsyncpa [#allocation7], 0 }
   0x2   :  { %9 = vsyncpa [#allocation5], 0  ;;  %s206_s9 = smov [#allocation3]  }
   0x3   :  { %s21_s10 = sshll.u32 %s206_s9, 4  ;;  %s22_s10 = int_to_ptr.vmem [resolvable:$true] %s21_s10 }
   0x4   :  { %s148_s11 = scalar_lea.vmem %s22_s10, 256  ;;  %p153_p1 = scmp.lt.s32.totalorder %s22_s10, %s22_s10 }
   0x5   :  { %p149_p0 = scmp.ne.s32.totalorder %s22_s10, %s148_s11  ;;  %p154_p2 = scmp.lt.s32.totalorder %s148_s11, %s148_s11 }
   0x7   :  { %p155_p3 = por %p154_p2, %p153_p1 }
   0x9   :  { %p156_p4 = pnand %p155_p3, %p149_p0 }
   0xb   :  { %159 = shalt.err (!%p156_p4)
}
   0xc   :  { %s207_s12 = smov 128   ;;  %s208_s13 = smov 8  }
   0xd   :  { %27 = dma.hbm_to_vmem [thread:$0]  %s236_s0, 256, %s22_s10, [#allocation4], %s207_s12, %s207_s12, %s208_s13  }
   0xe   :  { %s209_s16 = smov [#allocation6]  }
   0xf   :  { %s39_s17 = sshll.u32 %s209_s16, 4  ;;  %s40_s17 = int_to_ptr.vmem [resolvable:$true] %s39_s17 }
  0x10   :  { %s168_s18 = scalar_lea.vmem %s40_s17, 256  ;;  %p173_p6 = scmp.lt.s32.totalorder %s40_s17, %s40_s17 }
  0x11   :  { %p169_p5 = scmp.ne.s32.totalorder %s40_s17, %s168_s18  ;;  %p174_p7 = scmp.lt.s32.totalorder %s168_s18, %s168_s18 }
  0x13   :  { %p175_p8 = por %p174_p7, %p173_p6 }
  0x15   :  { %p176_p9 = pnand %p175_p8, %p169_p5 }
  0x17   :  { %179 = shalt.err (!%p176_p9)
}
  0x18   :  { %45 = dma.hbm_to_vmem [thread:$0]  %s237_s1, 256, %s40_s17, [#allocation7], %s207_s12, %s207_s12, %s208_s13  }
  0x19   :  { %200 = dma.done.wait [#allocation4], 256  }
  0x1a   :  { %201 = vsyncadd [#allocation4], 4294967040 }
  0x1b   :  { %202 = dma.done.wait [#allocation7], 256  }
  0x1c   :  { %203 = vsyncadd [#allocation7], 4294967040  ;;  %v65_v0 = vld [vmem:[#allocation3] sm:$0xff]  ;;  %v66_v1 = vld [vmem:[#allocation3 + $0x8] sm:$0xff]  ;;  %v210_v18 = vmov 0.75   ;;  %s211_s0 = smov [#allocation8]  }
  0x1d   :  { %v67_v2 = vld [vmem:[#allocation6] sm:$0xff]  ;;  %v68_v3 = vld [vmem:[#allocation6 + $0x8] sm:$0xff]  ;;  %v73_v6 = vsub.f32 1.0, %v65_v0  ;;  %v74_v8 = vsub.f32 1.0, %v66_v1  ;;  %s112_s1 = sshll.u32 %s211_s0, 4  ;;  %s113_s1 = int_to_ptr.vmem [resolvable:$true] %s112_s1 }
  0x1e   :  { %v126_v4 = vtrunc.f32 %v67_v2  ;;  %v128_v5 = vtrunc.f32 %v68_v3  ;;  %s180_s21 = scalar_lea.vmem %s113_s1, 128  ;;  %p185_p11 = scmp.lt.s32.totalorder %s113_s1, %s113_s1 }
  0x1f   :  { %p181_p10 = scmp.ne.s32.totalorder %s113_s1, %s180_s21  ;;  %p186_p12 = scmp.lt.s32.totalorder %s180_s21, %s180_s21 }
  0x20   :  { %v127_v7 = vcvt.f32.s32 %v126_v4  ;;  %v129_v9 = vcvt.f32.s32 %v128_v5 }
  0x21   :  { %p187_p13 = por %p186_p12, %p185_p11 }
  0x22   :  { %vm71_vm0 = vcmp.eq.s32.totalorder %v127_v7, 1  ;;  %vm72_vm1 = vcmp.eq.s32.totalorder %v129_v9, 1 }
  0x23   :  { %v75_v10 = vsel %vm71_vm0, %v65_v0, %v73_v6  ;;  %v76_v11 = vsel %vm72_vm1, %v66_v1, %v74_v8  ;;  %v89_v19 = vsel %vm71_vm0, 0.25, %v210_v18  ;;  %v90_v20 = vsel %vm72_vm1, 0.25, %v210_v18  ;;  %p188_p0 = pnand %p187_p13, %p181_p10 }
  0x24   :  { %v77_v12 = vmax.f32 %v75_v10, 0.0001  ;;  %v78_v13 = vmax.f32 %v76_v11, 0.0001  ;;  %v91_v22 = vsub.f32 0.0, %v89_v19  ;;  %v92_v24 = vsub.f32 0.0, %v90_v20 }
  0x26   :  { %v79_v14 = vmin.f32 %v77_v12, 1.0  ;;  %v80_v15 = vmin.f32 %v78_v13, 1.0 }
  0x28   :  { %136 = vlog2.f32 %v79_v14  ;;  %v85_v16 = vsub.f32 1.0, %v79_v14  ;;  %v86_v17 = vsub.f32 1.0, %v80_v15 }
  0x29   :  { %138 = vlog2.f32 %v80_v15 }
  0x2a   :  { %v87_v21 = vmul.f32 %v85_v16, %v85_v16  ;;  %v88_v23 = vmul.f32 %v86_v17, %v86_v17 }
  0x2c   :  { %v93_v25 = vmul.f32 %v91_v22, %v87_v21  ;;  %v94_v27 = vmul.f32 %v92_v24, %v88_v23 }
  0x35   :  { %v137_v26 = vpop.eup %136 }
  0x36   :  { %v139_v28 = vpop.eup %138  ;;  %v82_v29 = vmul.f32 0.6931472, %v137_v26 }
  0x37   :  { %v84_v30 = vmul.f32 0.6931472, %v139_v28 }
  0x38   :  { %v95_v31 = vmul.f32 %v93_v25, %v82_v29 }
  0x39   :  { %v96_v32 = vmul.f32 %v94_v27, %v84_v30 }
  0x3b   :  { %v98_v33 = vadd.f32 %v96_v32, %v95_v31 }
  0x3d   :  { %105 = vst [vmem:[#allocation8] sm:$0xff] %v98_v33 }
  0x3e   :  { %191 = shalt.err (!%p188_p0)
}
  0x3f   :  { %115 = dma.vmem_to_hbm [thread:$0]  %s113_s1, 128, %s238_s2, [#allocation5]  }
  0x40   :  { %204 = dma.done.wait [#allocation5], 128  }
  0x41   :  { %205 = vsyncadd [#allocation5], 4294967168 }
  0x42   :  { %119 = vsyncpa [#allocation4], 1 }
  0x43   :  { %120 = vsyncpa [#allocation7], 1 }
  0x44   :  { %121 = vsyncpa [#allocation5], 1 }

</bundles_post_ra>
